<compile_context>
chip_gen: v7x
topology: tpu7x:2x2x1
jax: 0.10.0
libtpu: 0.0.40
codegen_flags: <defaults>
</compile_context>

<pallas_src>
import numpy as np
import jax
import jax.numpy as jnp
from jax import lax
from jax.experimental import pallas as pl
from jax.experimental.pallas import tpu as pltpu


def _make_kernel(hidden, H):
    def kernel(adj_ref, x_ref, dbias_ref, pool_ref,
               w1_ref, w2_ref, wc1_ref, wc2_ref, wc3t_ref,
               bias_ref, bc3_ref, out_ref):
        f32 = jnp.float32

        adj = adj_ref[0]             # (Gn, Gn) block-diagonal adjacency (G graphs)
        x = x_ref[...]               # (Gn, in_dim) node features for G graphs

        bias = bias_ref[...]         # (8, 128) packed biases
        b1 = bias[0:1, 0:hidden]
        b2 = bias[1:2, 0:hidden]
        bc2 = bias[2:3, 0:H]

        # GraphConv 1: relu( Ahat_blk @ (X W1) + b1 )   -- one MXU pass each
        xw = jnp.dot(x, w1_ref[...], preferred_element_type=f32)
        h1 = jnp.maximum(jnp.dot(adj, xw, preferred_element_type=f32) + b1, 0.0)

        # GraphConv 2: relu( Ahat_blk @ (H1 W2) + b2 )
        hw = jnp.dot(h1, w2_ref[...], preferred_element_type=f32)
        h2 = jnp.maximum(jnp.dot(adj, hw, preferred_element_type=f32) + b2, 0.0)

        # dgl.mean_nodes for all G graphs at once: (G, Gn) @ (Gn, hidden)
        hg = jnp.dot(pool_ref[...], h2, preferred_element_type=f32)   # (G, hidden)

        # classify1 on concat([hg, desc]): desc branch + bc1 prefolded into dbias
        z = jnp.maximum(
            jnp.dot(hg, wc1_ref[...], preferred_element_type=f32) + dbias_ref[...],
            0.0)                                                       # (G, H)

        # classify2
        z = jnp.maximum(
            jnp.dot(z, wc2_ref[...], preferred_element_type=f32) + bc2, 0.0)

        # classify3 (no activation), emitted lane-dense as (n_classes, G):
        # out_t[c, g] = sum_h wc3t[c, h] * z[g, h] + bc3[c]
        out_t = lax.dot_general(wc3t_ref[...], z,
                                (((1,), (1,)), ((), ())),
                                preferred_element_type=f32) + bc3_ref[...]
        out_ref[0] = out_t

    return kernel


def _pick_group(B, n, target_rows=128):
    """Graphs per grid step: G*n ~= target_rows (128; use 256 on v6e/v7x for
    bigger problems) and G divides B."""
    g = max(1, min(B, target_rows // max(n, 1)))
    while g > 1 and B % g != 0:
        g -= 1
    return g


def gcn_reg_add_forward(adj_b, x_b, desc, params, n_classes, target_rows=128):
    """adj_b: (B, n, n) per-graph normalized adjacency; x_b: (B, n, in_dim);
    desc: (B, extra_in).  Returns (B, n_classes)."""
    B, n, in_dim = x_b.shape
    hidden = params["w2"].shape[1]
    extra_in = desc.shape[1]
    H = hidden + extra_in
    assert H <= 128 and hidden <= 128 and n_classes <= 128

    G = _pick_group(B, n, target_rows)
    S = B // G
    Gn = G * n

    f32 = jnp.float32

    # --- wrapper-side prepacking (one-time XLA work) -------------------------
    # Block-diagonal adjacency super-block per step: (S, Gn, Gn)
    adj_grp = adj_b.astype(f32).reshape(S, G, n, n)
    eye_g = jnp.eye(G, dtype=f32)
    adj_blk = (adj_grp[:, :, None, :, :] * eye_g[None, :, :, None, None])
    adj_blk = adj_blk.transpose(0, 1, 3, 2, 4).reshape(S, Gn, Gn)

    # Node features flattened: graph g occupies rows [g*n, (g+1)*n)
    x_flat = x_b.astype(f32).reshape(B * n, in_dim)

    # Descriptor branch folded into a per-graph bias: desc @ Wc1[hidden:] + bc1
    desc_bias = desc.astype(f32) @ params["wc1"][hidden:, :] + params["bc1"]  # (B, H)

    # Mean-pooling matrix (resident): pool[g, g*n + i] = 1/n
    # TODO(synk): for padded / variable-size graphs use per-graph node counts
    # here and mask padded rows before the ReLU bias leaks into the mean.
    pool = jnp.repeat(jnp.eye(G, dtype=f32), n, axis=1) / jnp.float32(n)      # (G, Gn)

    # Pack the remaining small biases into one (8, 128) buffer
    bias_pack = jnp.zeros((8, 128), f32)
    bias_pack = bias_pack.at[0, :hidden].set(params["b1"][0])
    bias_pack = bias_pack.at[1, :hidden].set(params["b2"][0])
    bias_pack = bias_pack.at[2, :H].set(params["bc2"][0])

    wc1_h = params["wc1"][:hidden, :]          # (hidden, H)
    wc3_t = params["wc3"].T                    # (n_classes, H)
    bc3_t = params["bc3"].T                    # (n_classes, 1)

    kernel = _make_kernel(hidden, H)

    grid_spec = pltpu.PrefetchScalarGridSpec(
        num_scalar_prefetch=0,
        grid=(S,),
        in_specs=[
            # per-step (pipelined) tensors
            pl.BlockSpec((1, Gn, Gn), lambda s: (s, 0, 0)),      # block-diag adjacency
            pl.BlockSpec((Gn, in_dim), lambda s: (s, 0)),        # node features
            pl.BlockSpec((G, H), lambda s: (s, 0)),              # desc bias (per graph)
            # resident constants (index map constant across the grid)
            pl.BlockSpec((G, Gn), lambda s: (0, 0)),             # pooling matrix
            pl.BlockSpec((in_dim, hidden), lambda s: (0, 0)),    # w1
            pl.BlockSpec((hidden, hidden), lambda s: (0, 0)),    # w2
            pl.BlockSpec((hidden, H), lambda s: (0, 0)),         # wc1 (hg rows only)
            pl.BlockSpec((H, H), lambda s: (0, 0)),              # wc2
            pl.BlockSpec((n_classes, H), lambda s: (0, 0)),      # wc3^T
            pl.BlockSpec((8, 128), lambda s: (0, 0)),            # bias pack
            pl.BlockSpec((n_classes, 1), lambda s: (0, 0)),      # bc3^T
        ],
        # lane-dense output: graphs along the lane axis
        out_specs=pl.BlockSpec((1, n_classes, G), lambda s: (s, 0, 0)),
    )

    out = pl.pallas_call(
        kernel,
        out_shape=jax.ShapeDtypeStruct((S, n_classes, G), f32),
        grid_spec=grid_spec,
        compiler_params=pltpu.CompilerParams(
            # batch-group axis is embarrassingly parallel -> megacore on v7x
            dimension_semantics=("parallel",),
            vmem_limit_bytes=32 * 1024 * 1024,
        ),
    )(adj_blk, x_flat, desc_bias, pool,
      params["w1"], params["w2"], wc1_h, params["wc2"], wc3_t,
      bias_pack, bc3_t)

    # TODO(synk): for very large per-graph n, tile the two Ahat matmuls over
    # node-row blocks with a VMEM f32 accumulator (and 256-row super-blocks on
    # v6e/v7x) instead of one (Gn, Gn) adjacency tile.
    return out.transpose(0, 2, 1).reshape(B, n_classes)


def reference_forward(adj_norm, x, pool, desc, params):
    # dense block-diagonal formulation (matches original DGL batched-graph
    # semantics): GraphConv x2 + mean_nodes + concat + 3 Linear
    h1 = jax.nn.relu(adj_norm @ (x @ params["w1"]) + params["b1"])
    h2 = jax.nn.relu(adj_norm @ (h1 @ params["w2"]) + params["b2"])
    hg = pool @ h2
    hgc = jnp.concatenate([hg, desc], axis=1)
    z = jax.nn.relu(hgc @ params["wc1"] + params["bc1"])
    z = jax.nn.relu(z @ params["wc2"] + params["bc2"])
    return z @ params["wc3"] + params["bc3"]


def init_linear(key, fan_in, fan_out):
    # nn.Linear-style uniform(-1/sqrt(fan_in), 1/sqrt(fan_in)), deterministic
    kw, kb = jax.random.split(key)
    bound = 1.0 / jnp.sqrt(jnp.float32(fan_in))
    w = jax.random.uniform(kw, (fan_in, fan_out), jnp.float32, -bound, bound)
    b = jax.random.uniform(kb, (1, fan_out), jnp.float32, -bound, bound)
    return w, b


if __name__ == "__main__":
    # small shapes consistent with the module
    in_dim, extra_in_dim, hidden_dim, n_classes = 4, 3, 32, 1
    B, n = 32, 8                   # 32 graphs of 8 nodes -> G=16 (128-row tile), 2 steps
    N = B * n

    key = jax.random.PRNGKey(0)
    k = jax.random.split(key, 8)

    # --- batch of B distinct small graphs (ring + one extra deterministic edge)
    adj_list = []
    for b in range(B):
        A = np.zeros((n, n), np.float32)
        for i in range(n):
            A[i, (i + 1) % n] = 1.0
            A[(i + 1) % n, i] = 1.0
        u, v = b % n, (b * 3 + 2) % n
        if u != v:
            A[u, v] = 1.0
            A[v, u] = 1.0
        deg = A.sum(axis=1)
        dinv = 1.0 / np.sqrt(deg)                       # all degrees > 0
        adj_list.append(dinv[:, None] * A * dinv[None, :])   # D^-1/2 A D^-1/2
    adj_b = jnp.asarray(np.stack(adj_list))             # (B, n, n)

    # node features and descriptors
    x_b = jax.random.normal(k[0], (B, n, in_dim), jnp.float32)
    desc = jax.random.normal(k[1], (B, extra_in_dim), jnp.float32)

    # --- deterministic parameters ------------------------------------------
    H = hidden_dim + extra_in_dim
    w1, b1 = init_linear(k[2], in_dim, hidden_dim)       # GraphConv1
    w2, b2 = init_linear(k[3], hidden_dim, hidden_dim)   # GraphConv2
    wc1, bc1 = init_linear(k[4], H, H)                   # classify1
    wc2, bc2 = init_linear(k[5], H, H)                   # classify2
    wc3, bc3 = init_linear(k[6], H, n_classes)           # classify3
    params = dict(w1=w1, b1=b1, w2=w2, b2=b2,
                  wc1=wc1, bc1=bc1, wc2=wc2, bc2=bc2, wc3=wc3, bc3=bc3)

    # TODO(synk): saliency=True branch (grad of output w.r.t. node features)
    # is autodiff, not a forward-kernel concern; only forward is implemented.

    out = gcn_reg_add_forward(adj_b, x_b, desc, params, n_classes)
    out = jax.block_until_ready(out)

    # reference on the equivalent dense block-diagonal batched graph
    adj_dense = jnp.zeros((N, N), jnp.float32)
    pool_ref_mat = jnp.zeros((B, N), jnp.float32)
    for b in range(B):
        adj_dense = adj_dense.at[b * n:(b + 1) * n, b * n:(b + 1) * n].set(adj_b[b])
        pool_ref_mat = pool_ref_mat.at[b, b * n:(b + 1) * n].set(1.0 / n)
    x_flat = x_b.reshape(N, in_dim)
    ref = reference_forward(adj_dense, x_flat, pool_ref_mat, desc, params)

    assert out.shape == (B, n_classes)
    assert jnp.allclose(out, ref, atol=1e-4, rtol=1e-4), (out, ref)

    print("KERNEL_OK")
</pallas_src>

<mosaic_0001>
module attributes {stable_mosaic.version = 11 : i64} {
  func.func @kernel(%arg0: i32, %arg1: memref<1x128x128xf32, #tpu.memory_space<vmem>>, %arg2: memref<128x4xf32, #tpu.memory_space<vmem>>, %arg3: memref<16x35xf32, #tpu.memory_space<vmem>>, %arg4: memref<16x128xf32, #tpu.memory_space<vmem>>, %arg5: memref<4x32xf32, #tpu.memory_space<vmem>>, %arg6: memref<32x32xf32, #tpu.memory_space<vmem>>, %arg7: memref<32x35xf32, #tpu.memory_space<vmem>>, %arg8: memref<35x35xf32, #tpu.memory_space<vmem>>, %arg9: memref<1x35xf32, #tpu.memory_space<vmem>>, %arg10: memref<8x128xf32, #tpu.memory_space<vmem>>, %arg11: memref<1x1xf32, #tpu.memory_space<vmem>>, %arg12: memref<1x1x16xf32, #tpu.memory_space<vmem>>) attributes {dimension_semantics = [#tpu.dimension_semantics<parallel>], iteration_bounds = array<i64: 2>, scalar_prefetch = 0 : i64, scratch_operands = 0 : i64, tpu.core_type = #tpu.core_type<tc>, window_params = [{transform_indices = @transform_0, window_bounds = array<i64: 1, 128, 128>}, {transform_indices = @transform_1, window_bounds = array<i64: 128, 4>}, {transform_indices = @transform_2, window_bounds = array<i64: 16, 35>}, {pipeline_mode = #tpu.pipeline_mode<synchronous>, transform_indices = @transform_3, window_bounds = array<i64: 16, 128>}, {pipeline_mode = #tpu.pipeline_mode<synchronous>, transform_indices = @transform_4, window_bounds = array<i64: 4, 32>}, {pipeline_mode = #tpu.pipeline_mode<synchronous>, transform_indices = @transform_5, window_bounds = array<i64: 32, 32>}, {pipeline_mode = #tpu.pipeline_mode<synchronous>, transform_indices = @transform_6, window_bounds = array<i64: 32, 35>}, {pipeline_mode = #tpu.pipeline_mode<synchronous>, transform_indices = @transform_7, window_bounds = array<i64: 35, 35>}, {pipeline_mode = #tpu.pipeline_mode<synchronous>, transform_indices = @transform_8, window_bounds = array<i64: 1, 35>}, {pipeline_mode = #tpu.pipeline_mode<synchronous>, transform_indices = @transform_9, window_bounds = array<i64: 8, 128>}, {pipeline_mode = #tpu.pipeline_mode<synchronous>, transform_indices = @transform_10, window_bounds = array<i64: 1, 1>}, {transform_indices = @transform_11, window_bounds = array<i64: 1, 1, 16>}]} {
    %c0 = arith.constant 0 : index
    %c0_0 = arith.constant 0 : index
    %c0_1 = arith.constant 0 : index
    %0 = vector.load %arg1[%c0, %c0_0, %c0_1] : memref<1x128x128xf32, #tpu.memory_space<vmem>>, vector<1x128x128xf32>
    %1 = vector.shape_cast %0 : vector<1x128x128xf32> to vector<128x128xf32>
    %c0_2 = arith.constant 0 : index
    %c0_3 = arith.constant 0 : index
    %2 = vector.load %arg2[%c0_2, %c0_3] : memref<128x4xf32, #tpu.memory_space<vmem>>, vector<128x4xf32>
    %c0_4 = arith.constant 0 : index
    %c0_5 = arith.constant 0 : index
    %3 = vector.load %arg10[%c0_4, %c0_5] : memref<8x128xf32, #tpu.memory_space<vmem>>, vector<8x128xf32>
    %4 = vector.extract_strided_slice %3 {offsets = [0, 0], sizes = [1, 32], strides = [1, 1]} : vector<8x128xf32> to vector<1x32xf32>
    %5 = vector.extract_strided_slice %3 {offsets = [1, 0], sizes = [1, 32], strides = [1, 1]} : vector<8x128xf32> to vector<1x32xf32>
    %6 = vector.extract_strided_slice %3 {offsets = [2, 0], sizes = [1, 35], strides = [1, 1]} : vector<8x128xf32> to vector<1x35xf32>
    %c0_6 = arith.constant 0 : index
    %c0_7 = arith.constant 0 : index
    %7 = vector.load %arg5[%c0_6, %c0_7] : memref<4x32xf32, #tpu.memory_space<vmem>>, vector<4x32xf32>
    %cst = arith.constant dense<0.000000e+00> : vector<128x32xf32>
    %8 = tpu.matmul %2, %7, %cst {dimension_numbers = #tpu.dot_dimension_numbers<[1], [0], [0], [1], [0, 0, 1, 1], [], []>} : vector<128x4xf32>, vector<4x32xf32>, vector<128x32xf32> -> vector<128x32xf32>
    %cst_8 = arith.constant dense<0.000000e+00> : vector<128x32xf32>
    %9 = tpu.matmul %1, %8, %cst_8 {dimension_numbers = #tpu.dot_dimension_numbers<[1], [0], [0], [1], [0, 0, 1, 1], [], []>} : vector<128x128xf32>, vector<128x32xf32>, vector<128x32xf32> -> vector<128x32xf32>
    %10 = vector.broadcast %4 : vector<1x32xf32> to vector<128x32xf32>
    %11 = arith.addf %9, %10 : vector<128x32xf32>
    %cst_9 = arith.constant 0.000000e+00 : f32
    %12 = vector.broadcast %cst_9 : f32 to vector<128x32xf32>
    %13 = arith.maximumf %11, %12 : vector<128x32xf32>
    %c0_10 = arith.constant 0 : index
    %c0_11 = arith.constant 0 : index
    %14 = vector.load %arg6[%c0_10, %c0_11] : memref<32x32xf32, #tpu.memory_space<vmem>>, vector<32x32xf32>
    %cst_12 = arith.constant dense<0.000000e+00> : vector<128x32xf32>
    %15 = tpu.matmul %13, %14, %cst_12 {dimension_numbers = #tpu.dot_dimension_numbers<[1], [0], [0], [1], [0, 0, 1, 1], [], []>} : vector<128x32xf32>, vector<32x32xf32>, vector<128x32xf32> -> vector<128x32xf32>
    %cst_13 = arith.constant dense<0.000000e+00> : vector<128x32xf32>
    %16 = tpu.matmul %1, %15, %cst_13 {dimension_numbers = #tpu.dot_dimension_numbers<[1], [0], [0], [1], [0, 0, 1, 1], [], []>} : vector<128x128xf32>, vector<128x32xf32>, vector<128x32xf32> -> vector<128x32xf32>
    %17 = vector.broadcast %5 : vector<1x32xf32> to vector<128x32xf32>
    %18 = arith.addf %16, %17 : vector<128x32xf32>
    %cst_14 = arith.constant 0.000000e+00 : f32
    %19 = vector.broadcast %cst_14 : f32 to vector<128x32xf32>
    %20 = arith.maximumf %18, %19 : vector<128x32xf32>
    %c0_15 = arith.constant 0 : index
    %c0_16 = arith.constant 0 : index
    %21 = vector.load %arg4[%c0_15, %c0_16] : memref<16x128xf32, #tpu.memory_space<vmem>>, vector<16x128xf32>
    %cst_17 = arith.constant dense<0.000000e+00> : vector<16x32xf32>
    %22 = tpu.matmul %21, %20, %cst_17 {dimension_numbers = #tpu.dot_dimension_numbers<[1], [0], [0], [1], [0, 0, 1, 1], [], []>} : vector<16x128xf32>, vector<128x32xf32>, vector<16x32xf32> -> vector<16x32xf32>
    %c0_18 = arith.constant 0 : index
    %c0_19 = arith.constant 0 : index
    %23 = vector.load %arg7[%c0_18, %c0_19] : memref<32x35xf32, #tpu.memory_space<vmem>>, vector<32x35xf32>
    %cst_20 = arith.constant dense<0.000000e+00> : vector<16x35xf32>
    %24 = tpu.matmul %22, %23, %cst_20 {dimension_numbers = #tpu.dot_dimension_numbers<[1], [0], [0], [1], [0, 0, 1, 1], [], []>} : vector<16x32xf32>, vector<32x35xf32>, vector<16x35xf32> -> vector<16x35xf32>
    %c0_21 = arith.constant 0 : index
    %c0_22 = arith.constant 0 : index
    %25 = vector.load %arg3[%c0_21, %c0_22] : memref<16x35xf32, #tpu.memory_space<vmem>>, vector<16x35xf32>
    %26 = arith.addf %24, %25 : vector<16x35xf32>
    %cst_23 = arith.constant 0.000000e+00 : f32
    %27 = vector.broadcast %cst_23 : f32 to vector<16x35xf32>
    %28 = arith.maximumf %26, %27 : vector<16x35xf32>
    %c0_24 = arith.constant 0 : index
    %c0_25 = arith.constant 0 : index
    %29 = vector.load %arg8[%c0_24, %c0_25] : memref<35x35xf32, #tpu.memory_space<vmem>>, vector<35x35xf32>
    %cst_26 = arith.constant dense<0.000000e+00> : vector<16x35xf32>
    %30 = tpu.matmul %28, %29, %cst_26 {dimension_numbers = #tpu.dot_dimension_numbers<[1], [0], [0], [1], [0, 0, 1, 1], [], []>} : vector<16x35xf32>, vector<35x35xf32>, vector<16x35xf32> -> vector<16x35xf32>
    %31 = vector.broadcast %6 : vector<1x35xf32> to vector<16x35xf32>
    %32 = arith.addf %30, %31 : vector<16x35xf32>
    %cst_27 = arith.constant 0.000000e+00 : f32
    %33 = vector.broadcast %cst_27 : f32 to vector<16x35xf32>
    %34 = arith.maximumf %32, %33 : vector<16x35xf32>
    %c0_28 = arith.constant 0 : index
    %c0_29 = arith.constant 0 : index
    %35 = vector.load %arg9[%c0_28, %c0_29] : memref<1x35xf32, #tpu.memory_space<vmem>>, vector<1x35xf32>
    %cst_30 = arith.constant dense<0.000000e+00> : vector<1x16xf32>
    %36 = tpu.matmul %35, %34, %cst_30 {dimension_numbers = #tpu.dot_dimension_numbers<[1], [1], [0], [0], [0, 0, 1, 0], [], []>} : vector<1x35xf32>, vector<16x35xf32>, vector<1x16xf32> -> vector<1x16xf32>
    %c0_31 = arith.constant 0 : index
    %c0_32 = arith.constant 0 : index
    %37 = vector.load %arg11[%c0_31, %c0_32] : memref<1x1xf32, #tpu.memory_space<vmem>>, vector<1x1xf32>
    %38 = vector.broadcast %37 : vector<1x1xf32> to vector<1x16xf32>
    %39 = arith.addf %36, %38 : vector<1x16xf32>
    %c0_33 = arith.constant 0 : index
    %c0_34 = arith.constant 0 : index
    %c0_35 = arith.constant 0 : index
    %40 = vector.load %arg12[%c0_33, %c0_34, %c0_35] : memref<1x1x16xf32, #tpu.memory_space<vmem>>, vector<1x1x16xf32>
    %41 = vector.shape_cast %40 : vector<1x1x16xf32> to vector<1x16xf32>
    %42 = vector.shape_cast %39 : vector<1x16xf32> to vector<1x1x16xf32>
    tpu.vector_store %arg12[%c0_33, %c0_34, %c0_35], %42 {strides = array<i32>} : memref<1x1x16xf32, #tpu.memory_space<vmem>>, vector<1x1x16xf32>,
    return
  }
  func.func @transform_0(%arg0: i32) -> (i32, i32, i32) {
    %c0_i32 = arith.constant 0 : i32
    %c0_i32_0 = arith.constant 0 : i32
    %c0_i32_1 = arith.constant 0 : i32
    return %arg0, %c0_i32, %c0_i32_0 : i32, i32, i32
  }
  func.func @transform_1(%arg0: i32) -> (i32, i32) {
    %c0_i32 = arith.constant 0 : i32
    %c0_i32_0 = arith.constant 0 : i32
    return %arg0, %c0_i32 : i32, i32
  }
  func.func @transform_2(%arg0: i32) -> (i32, i32) {
    %c0_i32 = arith.constant 0 : i32
    %c0_i32_0 = arith.constant 0 : i32
    return %arg0, %c0_i32 : i32, i32
  }
  func.func @transform_3(%arg0: i32) -> (i32, i32) {
    %c0_i32 = arith.constant 0 : i32
    %c0_i32_0 = arith.constant 0 : i32
    %c0_i32_1 = arith.constant 0 : i32
    return %c0_i32, %c0_i32_0 : i32, i32
  }
  func.func @transform_4(%arg0: i32) -> (i32, i32) {
    %c0_i32 = arith.constant 0 : i32
    %c0_i32_0 = arith.constant 0 : i32
    %c0_i32_1 = arith.constant 0 : i32
    return %c0_i32, %c0_i32_0 : i32, i32
  }
  func.func @transform_5(%arg0: i32) -> (i32, i32) {
    %c0_i32 = arith.constant 0 : i32
    %c0_i32_0 = arith.constant 0 : i32
    %c0_i32_1 = arith.constant 0 : i32
    return %c0_i32, %c0_i32_0 : i32, i32
  }
  func.func @transform_6(%arg0: i32) -> (i32, i32) {
    %c0_i32 = arith.constant 0 : i32
    %c0_i32_0 = arith.constant 0 : i32
    %c0_i32_1 = arith.constant 0 : i32
    return %c0_i32, %c0_i32_0 : i32, i32
  }
  func.func @transform_7(%arg0: i32) -> (i32, i32) {
    %c0_i32 = arith.constant 0 : i32
    %c0_i32_0 = arith.constant 0 : i32
    %c0_i32_1 = arith.constant 0 : i32
    return %c0_i32, %c0_i32_0 : i32, i32
  }
  func.func @transform_8(%arg0: i32) -> (i32, i32) {
    %c0_i32 = arith.constant 0 : i32
    %c0_i32_0 = arith.constant 0 : i32
    %c0_i32_1 = arith.constant 0 : i32
    return %c0_i32, %c0_i32_0 : i32, i32
  }
  func.func @transform_9(%arg0: i32) -> (i32, i32) {
    %c0_i32 = arith.constant 0 : i32
    %c0_i32_0 = arith.constant 0 : i32
    %c0_i32_1 = arith.constant 0 : i32
    return %c0_i32, %c0_i32_0 : i32, i32
  }
  func.func @transform_10(%arg0: i32) -> (i32, i32) {
    %c0_i32 = arith.constant 0 : i32
    %c0_i32_0 = arith.constant 0 : i32
    %c0_i32_1 = arith.constant 0 : i32
    return %c0_i32, %c0_i32_0 : i32, i32
  }
  func.func @transform_11(%arg0: i32) -> (i32, i32, i32) {
    %c0_i32 = arith.constant 0 : i32
    %c0_i32_0 = arith.constant 0 : i32
    %c0_i32_1 = arith.constant 0 : i32
    return %arg0, %c0_i32, %c0_i32_0 : i32, i32, i32
  }
}

</mosaic_0001>

<bundles_post_ra>
// kernel: tpu_custom_call.1
= control target key start
LH: loop header
LB: loop body
LE: loop exit
PB: predicated region body
PF: predicated region fallthrough
CT: control target
= control target key end

     0   :  { %s3203_s0 = inlined_call_operand.vmem [shape: f32[2,128,128], index: 0, kind: input, shape index: {}]   ;;  %s3204_s1 = inlined_call_operand.vmem [shape: f32[256,4], index: 1, kind: input, shape index: {}]   ;;  %s3205_s2 = inlined_call_operand.hbm [shape: f32[32,35], index: 2, kind: input, shape index: {}]   ;;  %s3206_s3 = inlined_call_operand.hbm [shape: f32[16,128], index: 3, kind: input, shape index: {}]   ;;  %s3207_s4 = inlined_call_operand.hbm [shape: f32[4,32], index: 4, kind: input, shape index: {}]   ;;  %s3208_s5 = inlined_call_operand.hbm [shape: f32[32,32], index: 5, kind: input, shape index: {}]   ;;  %s3209_s6 = inlined_call_operand.vmem [shape: f32[32,35], index: 6, kind: input, shape index: {}]   ;;  %s3210_s7 = inlined_call_operand.hbm [shape: f32[35,35], index: 7, kind: input, shape index: {}]   ;;  %s3211_s8 = inlined_call_operand.vmem [shape: f32[1,35], index: 8, kind: input, shape index: {}]   ;;  %s3212_s9 = inlined_call_operand.vmem [shape: f32[8,128], index: 9, kind: input, shape index: {}]   ;;  %s3213_s10 = inlined_call_operand.<no memory space> [shape: f32[1,1], index: 10, kind: input, shape index: {}]   ;;  %s3214_s11 = inlined_call_operand.hbm [shape: f32[2,1,16], index: 11, kind: output, shape index: {}]  }
   0x1   :  { %3221 = sst [smem:[#allocation19_spill]] %s3211_s8  ;;  %v16_v0 = vstv %s3213_s10 }
   0x2   :  { %3222 = sst [smem:[#allocation20_spill]] %s3214_s11  ;;  %17 = vst [vmem:[#allocation2] sm:$0x1] %v16_v0 }
   0x3   :  { %18 = vsyncpa [#allocation4], 0 }
   0x4   :  { %20 = vsyncpa [#allocation4 + $0x1], 0 }
   0x5   :  { %21 = vsyncpa [#allocation7], 0 }
   0x6   :  { %22 = vsyncpa [#allocation10], 0 }
   0x7   :  { %23 = vsyncpa [#allocation5], 0 }
   0x8   :  { %25 = vsyncpa [#allocation5 + $0x1], 0  ;;  %s2709_s19 = smov 0   ;;  %s2711_s20 = smov 0  }
   0x9   :  { %s2713_s21 = smov 0   ;;  %s2715_s22 = smov 0  }
   0xa LB: > { %3223 = sst [smem:[#allocation17_spill]] %s2620_s19  ;;  %s2730_s10 = sadd.s32 4294967295, %s2632_s22   ;;  %s2632_s22 = sphi %s2715_s22, %s3248_s22   ;;  %s2628_s21 = sphi %s2713_s21, %s3247_s21   ;;  %s2624_s20 = sphi %s2711_s20, %s3246_s20   ;;  %s2620_s19 = sphi %s2709_s19, %s3245_s19  }
   0xb   : > { %s1761_s23 = sadd.s32 4294967294, %s2632_s22   ;;  %p103_p0 = scmp.ne.s32.totalorder %s2624_s20, %s2620_s19 }
   0xc   : > { %p3215_p1 = scmp.eq.s32.totalorder %s2730_s10, 0  ;;  %p301_p3 = scmp.eq.s32.totalorder %s1761_s23, 1 }
   0xd   : > { %p1762_p5 = scmp.ge.s32.totalorder %s2632_s22, 1  ;;  %p308_p7 = scmp.lt.s32.totalorder %s2632_s22, 3 }
   0xe   : > { %p2739_p4 = por %p3215_p1, %p103_p0  ;;  %p2744_p6 = por %p301_p3, %p103_p0 }
   0xf   : > { %p2749_p8 = pnand %p1762_p5, %p308_p7  ;;  %s2634_s27 = smov [#allocation6]  }
  0x10   : > { %s3224_s24 = scalar_select %p2739_p4, 1, 0 }
  0x11   : > { %s3225_s25 = scalar_select %p2744_p6, 1, 0 }
  0x12   : > { %s3227_s26 = scalar_select %p2749_p8, 1, 0 }
  0x13   : > { %3226 = sst [smem:[#allocation18_spill]] %s3225_s25  ;;  %s320_s28 = sshll.u32 %s2634_s27, 4  ;;  %s2753_s28 = int_to_ptr.vmem [resolvable:$true] %s320_s28 }
  0x14   : > { %p2342_p9 = pneg %p2749_p8  ;;  %s2635_s30 = smov [#allocation9]  }
  0x15   : > { %s344_s12 = sshll.u32 %s2635_s30, 4  ;;  %s2636_s13 = smov [#allocation8]   ;;  %s2764_s12 = int_to_ptr.vmem [resolvable:$true] %s344_s12 }
  0x16   : > { %p2760_p11 = pnand %p2342_p9, %p3215_p1  ;;  %s2766_s14 = sshll.u32 %s2636_s13, 4  ;;  %s335_s14 = int_to_ptr.vmem [resolvable:$true] %s2766_s14 }
  0x17   : > { %s2416_s17 = scalar_lea.hbm %s3206_s3, 256 }
  0x18   : > { %p2417_p12 = scmp.ne.s32.totalorder %s3206_s3, %s2416_s17  ;;  %p2776_p13 = pneg %p2760_p11 }
  0x19   : > { %p2423_p5 = scmp.lt.u32.totalorder %s2416_s17, %s3206_s3 }
  0x1a   : > { %p2419_p0 = pnand %p2776_p13, %p2417_p12 }
  0x1c   : > { %p2420_p3 = pneg %p2419_p0 }
  0x1e   : > { %p2425_p7 = pnand %p2423_p5, %p2420_p3 }
  0x20   : > { %2428 = shalt.err (!%p2425_p7)
}
  0x21   : > { %s2429_s15 = scalar_lea.vmem %s2753_s28, 256  ;;  %p2437_p2 = scmp.lt.s32.totalorder %s2753_s28, %s2753_s28 }
  0x22   : > { %p2430_p9 = scmp.ne.s32.totalorder %s2753_s28, %s2429_s15  ;;  %p2438_p6 = scmp.lt.s32.totalorder %s2429_s15, %s2429_s15 }
  0x24   : > { %p2432_p10 = pnand %p2430_p9, %p2776_p13  ;;  %p2439_p12 = por %p2438_p6, %p2437_p2 }
  0x26   : > { %p2433_p1 = pneg %p2432_p10 }
  0x28   : > { %p2440_p0 = pnand %p2439_p12, %p2433_p1 }
  0x2a   : > { %2443 = shalt.err (!%p2440_p0)
}
  0x2b   : > { %s2637_s16 = smov 128   ;;  %s2638_s17 = smov 8  }
  0x2c   : > { %2345 = dma.hbm_to_vmem [thread:$0]  (!%p2760_p11), %s3206_s3, 256, %s2753_s28, [#allocation7], %s2637_s16, %s2637_s16, %s2638_s17  }
  0x2d   : > { %s2444_s15 = scalar_lea.hbm %s3208_s5, 512 }
  0x2e   : > { %p2445_p1 = scmp.ne.s32.totalorder %s3208_s5, %s2444_s15  ;;  %p2451_p10 = scmp.lt.u32.totalorder %s2444_s15, %s3208_s5 }
  0x30   : > { %p2447_p2 = pnand %p2445_p1, %p2776_p13 }
  0x32   : > { %p2448_p6 = pneg %p2447_p2 }
  0x34   : > { %p2453_p3 = pnand %p2451_p10, %p2448_p6 }
  0x36   : > { %2456 = shalt.err (!%p2453_p3)
}
  0x37   : > { %s2457_s28 = scalar_lea.vmem %s2764_s12, 512  ;;  %p2465_p12 = scmp.lt.s32.totalorder %s2764_s12, %s2764_s12 }
  0x38   : > { %p2458_p5 = scmp.ne.s32.totalorder %s2764_s12, %s2457_s28  ;;  %p2466_p0 = scmp.lt.s32.totalorder %s2457_s28, %s2457_s28 }
  0x3a   : > { %p2460_p7 = pnand %p2458_p5, %p2776_p13  ;;  %p2467_p1 = por %p2466_p0, %p2465_p12 }
  0x3c   : > { %p2461_p9 = pneg %p2460_p7 }
  0x3e   : > { %p2468_p2 = pnand %p2467_p1, %p2461_p9 }
  0x40   : > { %2471 = shalt.err (!%p2468_p2)
}
  0x41   : > { %2351 = dma.hbm_to_vmem [thread:$0]  (!%p2760_p11), %s3208_s5, 512, %s2764_s12, [#allocation10], %s2637_s16, %s2637_s16, %s2638_s17  }
  0x42   : > { %s2472_s18 = scalar_lea.hbm %s3207_s4, 64 }
  0x43   : > { %p2473_p6 = scmp.ne.s32.totalorder %s3207_s4, %s2472_s18  ;;  %p2479_p5 = scmp.lt.u32.totalorder %s2472_s18, %s3207_s4 }
  0x45   : > { %p2475_p10 = pnand %p2473_p6, %p2776_p13 }
  0x47   : > { %p2476_p3 = pneg %p2475_p10 }
  0x49   : > { %p2481_p7 = pnand %p2479_p5, %p2476_p3 }
  0x4b   : > { %2484 = shalt.err (!%p2481_p7)
}
  0x4c   : > { %s2485_s28 = scalar_lea.vmem %s335_s14, 64  ;;  %p2493_p1 = scmp.lt.s32.totalorder %s335_s14, %s335_s14 }
  0x4d   : > { %p2486_p9 = scmp.ne.s32.totalorder %s335_s14, %s2485_s28  ;;  %p2494_p2 = scmp.lt.s32.totalorder %s2485_s28, %s2485_s28 }
  0x4f   : > { %p2488_p12 = pnand %p2486_p9, %p2776_p13  ;;  %p2495_p4 = por %p2494_p2, %p2493_p1 }
  0x51   : > { %p2489_p0 = pneg %p2488_p12 }
  0x53   : > { %p2496_p8 = pnand %p2495_p4, %p2489_p0 }
  0x55   : > { %2499 = shalt.err (!%p2496_p8)
}
  0x56   : > { %2348 = dma.hbm_to_vmem [thread:$0]  (!%p2760_p11), %s3207_s4, 64, %s335_s14, [#allocation7]  }
  0x57   : > { %s2639_s11 = smov [#allocation11]   ;;  %s2500_s23 = scalar_lea.hbm %s3210_s7, 640 }
  0x58   : > { %s360_s19 = sshll.u32 %s2639_s11, 4  ;;  %p2501_p6 = scmp.ne.s32.totalorder %s3210_s7, %s2500_s23  ;;  %s361_s19 = int_to_ptr.vmem [resolvable:$true] %s360_s19 }
  0x59   : > { %p2507_p10 = scmp.lt.u32.totalorder %s2500_s23, %s3210_s7 }
  0x5a   : > { %p2503_p4 = pnand %p2501_p6, %p2776_p13 }
  0x5c   : > { %p2504_p8 = pneg %p2503_p4 }
  0x5e   : > { %p2509_p3 = pnand %p2507_p10, %p2504_p8 }
  0x60   : > { %2512 = shalt.err (!%p2509_p3)
}
  0x61   : > { %s2513_s14 = scalar_lea.vmem %s361_s19, 640  ;;  %p2521_p12 = scmp.lt.s32.totalorder %s361_s19, %s361_s19 }
  0x62   : > { %p2514_p5 = scmp.ne.s32.totalorder %s361_s19, %s2513_s14  ;;  %p2522_p0 = scmp.lt.s32.totalorder %s2513_s14, %s2513_s14 }
  0x64   : > { %p2516_p7 = pnand %p2514_p5, %p2776_p13  ;;  %p2523_p1 = por %p2522_p0, %p2521_p12 }
  0x66   : > { %p2517_p9 = pneg %p2516_p7 }
  0x68   : > { %p2524_p2 = pnand %p2523_p1, %p2517_p9 }
  0x6a   : > { %2527 = shalt.err (!%p2524_p2)
}
  0x6b   : > { %2354 = dma.hbm_to_vmem [thread:$0]  (!%p2760_p11), %s3210_s7, 640, %s361_s19, [#allocation10], %s2637_s16, %s2637_s16, %s2638_s17  }
  0x6c   : > { %s2867_s27 = sadd.s32 1, %s2632_s22   ;;  %s90_s29 = sadd.s32 1, %s2628_s21 }
  0x6d   : > { %s87_s11 = ssub.s32 %s2632_s22, %s2867_s27  ;;  %p97_p13 = scmp.ne.s32.totalorder %s2628_s21, %s2624_s20 }
  0x6e   : > { %p88_p6 = scmp.eq.s32.totalorder %s87_s11, 0  ;;  %p98_p4 = scmp.eq.s32.totalorder %s2632_s22, 0 }
  0x6f   : > { %p3230_p8 = scmp.eq.s32.totalorder %s2730_s10, 1  ;;  %p2367_p3 = scmp.lt.s32.totalorder %s2632_s22, 2 }
  0x70   : > { %s2883_s18 = scalar_select %p88_p6, %s2628_s21, %s90_s29  }
  0x71   : > { %p2877_p10 = por %p3230_p8, %p97_p13  ;;  %p99_p5 = por %p98_p4, %p97_p13 }
  0x72   : > { %s400_s23 = sand.u32 1, %s2628_s21   ;;  %s1825_s19 = sshll.u32 %s2632_s22, 8 }
  0x73   : > { %s1768_s30 = sshll.u32 %s400_s23, 4  ;;  %s2890_s28 = scalar_lea.hbm %s3205_s2, %s1825_s19 }
  0x74   : > { %s404_s14 = scalar_lea.vmem [#allocation3], %s1768_s30  ;;  %p2894_p11 = pnand %p2367_p3, %p99_p5 }
  0x75   : > { %s411_s12 = sshll.u32 %s404_s14, 4  ;;  %s2898_s29 = scalar_lea.sflag [#allocation4], %s400_s23  ;;  %s2892_s12 = int_to_ptr.vmem [resolvable:$true] %s411_s12 }
  0x76   : > { %s2528_s11 = scalar_lea.hbm %s2890_s28, 256  ;;  %p2530_p9 = pneg %p2894_p11 }
  0x77   : > { %p2529_p7 = scmp.ne.s32.totalorder %s2890_s28, %s2528_s11  ;;  %s2533_s13 = scalar_lea.hbm %s3205_s2, 512 }
  0x78   : > { %p2534_p1 = scmp.lt.u32.totalorder %s2890_s28, %s3205_s2  ;;  %p2535_p2 = scmp.lt.u32.totalorder %s2533_s13, %s2528_s11 }
  0x79   : > { %p2531_p12 = pnand %p2530_p9, %p2529_p7  ;;  %p2537_p6 = scmp.lt.u32.totalorder %s2528_s11, %s2890_s28 }
  0x7a   : > { %p2536_p13 = por %p2535_p2, %p2534_p1 }
  0x7b   : > { %p2532_p0 = pneg %p2531_p12 }
  0x7c   : > { %p2538_p4 = por %p2537_p6, %p2536_p13 }
  0x7e   : > { %p2539_p8 = pnand %p2538_p4, %p2532_p0 }
  0x80   : > { %2542 = shalt.err (!%p2539_p8)
}
  0x81   : > { %s2543_s23 = scalar_lea.vmem %s2892_s12, 256  ;;  %s2640_s30 = smov [#allocation3]  }
  0x82   : > { %p2544_p3 = scmp.ne.s32.totalorder %s2892_s12, %s2543_s23  ;;  %s2548_s19 = sshll.u32 %s2640_s30, 4  ;;  %s2549_s19 = int_to_ptr.vmem [resolvable:$false] %s2548_s19 }
  0x83   : > { %s2550_s15 = scalar_lea.vmem %s2549_s19, 512  ;;  %p2551_p12 = scmp.lt.s32.totalorder %s2892_s12, %s2549_s19 }
  0x84   : > { %p2546_p5 = pnand %p2544_p3, %p2530_p9  ;;  %p2552_p1 = scmp.lt.s32.totalorder %s2550_s15, %s2543_s23 }
  0x86   : > { %p2547_p7 = pneg %p2546_p5  ;;  %p2553_p2 = por %p2552_p1, %p2551_p12 }
  0x88   : > { %p2554_p13 = pnand %p2553_p2, %p2547_p7 }
  0x8a   : > { %2557 = shalt.err (!%p2554_p13)
}
  0x8b   : > { %2358 = dma.hbm_to_vmem [thread:$0]  (!%p2894_p11), %s2890_s28, 256, %s2892_s12, %s2898_s29, %s2637_s16, %s2637_s16, %s2638_s17  }
  0x8c   : > { %p3233_p9 = scmp.ne.s32.totalorder %s3227_s26, 0 }
  0x8d   : > { %s2932_s11 = sand.u32 (!%p3233_p9), 1, %s2624_s20   ;;  %p3234_p0 = scmp.ne.s32.totalorder (!%p3233_p9), %s3224_s24, 0 }
  0x8e   : > { %423 = sbr.rel (%p3233_p9) target bundleno = 2015 (0x7df), region = 64  ;;  %s1772_s13 = sshll.u32 (!%p3233_p9), %s2932_s11, 4 }
  0x8f   : > { %s426_s14 = scalar_lea.sflag (!%p3233_p9), [#allocation4], %s2932_s11  ;;  %s2936_s23 = scalar_lea.vmem (!%p3233_p9), [#allocation3], %s1772_s13 }
  0x95   : > { %2603 = dma.done.wait (%p3234_p0), %s426_s14, 256  }
  0x96   : > { %2605 = vsyncadd (%p3234_p0), %s426_s14, 4294967040  ;;  %p3235_p11 = scmp.eq.s32.totalorder %s2730_s10, 0 }
  0x98   : > { %2607 = dma.done.wait (%p3235_p11), [#allocation7], 320   ;;  %p3236_p6 = pmov %p3235_p11 }
  0x9a   : > { %2609 = vsyncadd (%p3236_p6), [#allocation7], 4294966976  ;;  %p3237_p4 = pmov %p3236_p6 }
  0x9c   : > { %2611 = dma.done.wait (%p3237_p4), [#allocation10], 1152   ;;  %p3238_p8 = pmov %p3237_p4 }
  0x9d   : > { %s2951_s26 = sshll.u32 %s2730_s10, 4  ;;  %vm588_vm0 = vcmask 1043456   ;;  %vm539_vm1 = vcmask 31744   ;;  %v538_v1 = vld [vmem:[#allocation8] sm:$0xf]  ;;  %p493_p5 = scmp.lt.s32.totalorder %s2730_s10, 1  ;;  %v737_v0 = vlaneseq }
  0x9e   : > { %2613 = vsyncadd (%p3238_p8), [#allocation10], 4294966144  ;;  %p499_p3 = scmp.lt.s32.totalorder %s2951_s26, 31  ;;  %1962 = vmatprep.subr.msk.mxu0 %vm588_vm0, %v538_v1  ;;  %v902_v19 = vld [vmem:[#allocation9] sm:$0xff]  ;;  %v903_v20 = vld [vmem:[#allocation9 + $0x8] sm:$0xff]  ;;  %vm906_vm2 = vcmask 261120  }
  0x9f   : > { %1963 = vmatpush3.msk.msra.mxu0 %vm588_vm0, %v538_v1  ;;  %s3250_s10 = smov (!%p493_p5, %s2730_s10), 1  ;;  %v904_v21 = vld [vmem:[#allocation9 + $0x10] sm:$0xff]  ;;  %v2230_v22 = vpack.c.bf16 %v903_v20, %v902_v19  ;;  %v905_v23 = vld [vmem:[#allocation9 + $0x18] sm:$0xff]  ;;  %v3064_v1 = vshrl.u32 %v737_v0, 7  ;;  %vm1447_vm3 = vcmask 1042432   ;;  %vm1440_vm4 = vcmask 285696  }
  0xa0   : > { %s500_s24 = scalar_select %p499_p3, %s2951_s26, 31  ;;  %v2234_v24 = vpack.c.bf16 %v905_v23, %v904_v21  ;;  %vm2642_vm5 = vmmov 0   ;;  %vm2320_vm6 = vmpackc.low %vm1440_vm4, %vm1440_vm4  ;;  %vm1618_vm7 = vcmask 122880  }
  0xa1   : > { %s1826_s8 = sshll.u32 %s3250_s10, 7  ;;  %2231 = vmatprep.subr.bf16.mxu0 %v2230_v22  ;;  %s3239_s30 = sld [smem:[#allocation19_spill]] }
  0xa2   : > { %s1780_s16 = sshll.u32 %s500_s24, 3  ;;  %s2997_s19 = scalar_lea.vmem %s3203_s0, %s1826_s8 }
  0xa3   : > { %s2958_s12 = scalar_lea.vmem %s3204_s1, %s1780_s16  ;;  %v3000_v18 = vld [vmem:[%s2997_s19] sm:$0xff]  ;;  %v3004_v49 = vld [vmem:[%s2997_s19 + $0x8] sm:$0xff]  ;;  %v3007_v50 = vld [vmem:[%s2997_s19 + $0x10] sm:$0xff]  ;;  %s3240_s14 = sld [smem:[#allocation20_spill]] }
  0xa4   : > { %v521_v2 = vld [vmem:[%s2958_s12] sm:$0xff]  ;;  %v522_v3 = vld [vmem:[%s2958_s12 + $0x8] sm:$0xff]  ;;  %v523_v4 = vld [vmem:[%s2958_s12 + $0x10] sm:$0xff]  ;;  %2020 = vmatprep.mubr.f32.mxu1 %v3000_v18  ;;  %s1621_s16 = scalar_lea.sflag [#allocation5], %s2932_s11  ;;  %s2645_s28 = smov [#allocation12]  }
  0xa5   : > { %1964 = vmatprep.mubr.msk.f32.mxu0 %vm539_vm1, %v521_v2  ;;  %v524_v5 = vld [vmem:[%s2958_s12 + $0x18] sm:$0xff]  ;;  %v525_v6 = vld [vmem:[%s2958_s12 + $0x20] sm:$0xff]  ;;  %v526_v7 = vld [vmem:[%s2958_s12 + $0x28] sm:$0xff]  ;;  %v739_v2 = vsub.s32 0, %v3064_v1 }
  0xa6   : > { %1965 = vmatmul.mubr.msk.f32.vlgmr.msra.gmra.mrb[0].mxu0 %vm539_vm1, %v522_v3  ;;  %v527_v8 = vld [vmem:[%s2958_s12 + $0x30] sm:$0xff]  ;;  %v528_v9 = vld [vmem:[%s2958_s12 + $0x38] sm:$0xff]  ;;  %v529_v10 = vld [vmem:[%s2958_s12 + $0x40] sm:$0xff] }
  0xa7   : > { %1967 = vmatprep.mubr.msk.f32.mxu0 %vm539_vm1, %v523_v4  ;;  %v530_v11 = vld [vmem:[%s2958_s12 + $0x48] sm:$0xff]  ;;  %v531_v12 = vld [vmem:[%s2958_s12 + $0x50] sm:$0xff]  ;;  %v532_v13 = vld [vmem:[%s2958_s12 + $0x58] sm:$0xff]  ;;  %2233 = vmatpush3.bf16.msra.mxu0 %v2230_v22 }
  0xa8   : > { %v533_v14 = vld [vmem:[%s2958_s12 + $0x60] sm:$0xff]  ;;  %v534_v15 = vld [vmem:[%s2958_s12 + $0x68] sm:$0xff]  ;;  %v535_v16 = vld [vmem:[%s2958_s12 + $0x70] sm:$0xff]  ;;  %2235 = vmatprep.subr.bf16.mxu0 %v2234_v24 }
  0xa9   : > { %v536_v17 = vld [vmem:[%s2958_s12 + $0x78] sm:$0xff]  ;;  %v3015_v52 = vld [vmem:[%s2997_s19 + $0x20] sm:$0xff]  ;;  %v3020_v53 = vld [vmem:[%s2997_s19 + $0x28] sm:$0xff]  ;;  %s3159_s24 = scalar_lea.hbm %s3240_s14, %s2951_s26  ;;  %s2562_s12 = sshll.u32 %s2645_s28, 4  ;;  %s2563_s12 = int_to_ptr.vmem [resolvable:$false] %s2562_s12 }
  0xaa   : > { %1968 = vmatmul.mubr.msk.f32.gmra.mrb[2].mxu0 %vm539_vm1, %v524_v5  ;;  %v3012_v51 = vld [vmem:[%s2997_s19 + $0x18] sm:$0xff]  ;;  %v3023_v54 = vld [vmem:[%s2997_s19 + $0x30] sm:$0xff]  ;;  %v3031_v56 = vld [vmem:[%s2997_s19 + $0x40] sm:$0xff]  ;;  %s2564_s8 = scalar_lea.vmem %s2563_s12, 32 }
  0xab   : > { %1970 = vmatprep.mubr.msk.f32.mxu0 %vm539_vm1, %v525_v6  ;;  %2237 = vmatpush3.bf16.msra.mxu0 %v2234_v24  ;;  %v3028_v55 = vld [vmem:[%s2997_s19 + $0x38] sm:$0xff]  ;;  %v3036_v57 = vld [vmem:[%s2997_s19 + $0x48] sm:$0xff]  ;;  %v3039_v58 = vld [vmem:[%s2997_s19 + $0x50] sm:$0xff] }
  0xac   : > { %v3044_v59 = vld [vmem:[%s2997_s19 + $0x58] sm:$0xff]  ;;  %v3047_v60 = vld [vmem:[%s2997_s19 + $0x60] sm:$0xff]  ;;  %v3052_v61 = vld [vmem:[%s2997_s19 + $0x68] sm:$0xff] }
  0xad   : > { %v3055_v62 = vld [vmem:[%s2997_s19 + $0x70] sm:$0xff]  ;;  %v3060_v63 = vld [vmem:[%s2997_s19 + $0x78] sm:$0xff]  ;;  %v3070_v3 = vld [vmem:[%s3212_s9] sm:$0xff]  ;;  %s492_s19 = scalar_lea.vmem [#allocation12], %s2932_s11 }
  0xae   : > { %1971 = vmatmul.mubr.msk.f32.gmra.mrb[4].mxu0 %vm539_vm1, %v526_v7  ;;  %v740_v4 = vrot.slane %v3070_v3, %v739_v2  ;;  %s1633_s10 = sshll.u32 %s492_s19, 4  ;;  %s3161_s10 = int_to_ptr.vmem [resolvable:$true] %s1633_s10 }
  0xaf   : > { %1973 = vmatprep.mubr.msk.f32.mxu0 %vm539_vm1, %v527_v8  ;;  %s2558_s17 = scalar_lea.vmem %s3161_s10, 16  ;;  %p2565_p2 = scmp.lt.s32.totalorder %s3161_s10, %s2563_s12 }
  0xb0   : > { %p2559_p7 = scmp.ne.s32.totalorder %s3161_s10, %s2558_s17  ;;  %p2566_p13 = scmp.lt.s32.totalorder %s2564_s8, %s2558_s17 }
  0xb2   : > { %1974 = vmatmul.mubr.msk.f32.gmra.mrb[6].mxu0 %vm539_vm1, %v528_v9  ;;  %p2560_p12 = pnand %p2559_p7, %p2877_p10  ;;  %p2567_p9 = por %p2566_p13, %p2565_p2 }
  0xb3   : > { %1976 = vmatprep.mubr.msk.f32.mxu0 %vm539_vm1, %v529_v10 }
  0xb4   : > { %p2561_p1 = pneg %p2560_p12 }
  0xb6   : > { %1977 = vmatmul.mubr.msk.f32.gmra.mrb[8].mxu0 %vm539_vm1, %v530_v11  ;;  %p2568_p0 = pnand %p2567_p9, %p2561_p1 }
  0xb7   : > { %1979 = vmatprep.mubr.msk.f32.mxu0 %vm539_vm1, %v531_v12 }
  0xba   : > { %1980 = vmatmul.mubr.msk.f32.gmra.mrb[10].mxu0 %vm539_vm1, %v532_v13 }
  0xbb   : > { %1982 = vmatprep.mubr.msk.f32.mxu0 %vm539_vm1, %v533_v14 }
  0xbe   : > { %1983 = vmatmul.mubr.msk.f32.gmra.mrb[12].mxu0 %vm539_vm1, %v534_v15 }
  0xbf   : > { %1985 = vmatprep.mubr.msk.f32.mxu0 %vm539_vm1, %v535_v16 }
  0xc2   : > { %1986 = vmatmul.mubr.msk.f32.gmra.mrb[14].mxu0 %vm539_vm1, %v536_v17 }
 0x179   : > { %v1966_v25 = vpop.f32.mrb[0].mxu0 }
 0x17a   : > { %v658_v26 = vpop.f32.mrb[1].mxu0 }
 0x17b   : > { %v2198_v27 = vpack.c.bf16 %v1966_v25, %v658_v26 }
 0x17d   : > { %v1969_v28 = vpop.f32.mrb[2].mxu0  ;;  %2199 = vmatprep.subr.bf16.mxu1 %v2198_v27 }
 0x17e   : > { %v668_v29 = vpop.f32.mrb[3].mxu0  ;;  %2201 = vmatpush3.bf16.msra.mxu1 %v2198_v27 }
 0x17f   : > { %v2202_v30 = vpack.c.bf16 %v1969_v28, %v668_v29 }
 0x181   : > { %v1972_v31 = vpop.f32.mrb[4].mxu0  ;;  %2203 = vmatprep.subr.bf16.mxu1 %v2202_v30 }
 0x182   : > { %v678_v32 = vpop.f32.mrb[5].mxu0  ;;  %2205 = vmatpush3.bf16.msra.mxu1 %v2202_v30 }
 0x183   : > { %v2206_v33 = vpack.c.bf16 %v1972_v31, %v678_v32 }
 0x185   : > { %v1975_v34 = vpop.f32.mrb[6].mxu0  ;;  %2207 = vmatprep.subr.bf16.mxu1 %v2206_v33 }
 0x186   : > { %v688_v35 = vpop.f32.mrb[7].mxu0  ;;  %2209 = vmatpush3.bf16.msra.mxu1 %v2206_v33 }
 0x187   : > { %v2210_v36 = vpack.c.bf16 %v1975_v34, %v688_v35 }
 0x189   : > { %v1978_v37 = vpop.f32.mrb[8].mxu0  ;;  %2211 = vmatprep.subr.bf16.mxu1 %v2210_v36 }
 0x18a   : > { %v698_v38 = vpop.f32.mrb[9].mxu0  ;;  %2213 = vmatpush3.bf16.msra.mxu1 %v2210_v36 }
 0x18b   : > { %v2214_v39 = vpack.c.bf16 %v1978_v37, %v698_v38 }
 0x18d   : > { %v1981_v40 = vpop.f32.mrb[10].mxu0  ;;  %2215 = vmatprep.subr.bf16.mxu1 %v2214_v39 }
 0x18e   : > { %v708_v41 = vpop.f32.mrb[11].mxu0  ;;  %2217 = vmatpush3.bf16.msra.mxu1 %v2214_v39 }
 0x18f   : > { %v2218_v42 = vpack.c.bf16 %v1981_v40, %v708_v41 }
 0x191   : > { %v1984_v43 = vpop.f32.mrb[12].mxu0  ;;  %2219 = vmatprep.subr.bf16.mxu1 %v2218_v42 }
 0x192   : > { %v718_v44 = vpop.f32.mrb[13].mxu0  ;;  %2221 = vmatpush3.bf16.msra.mxu1 %v2218_v42 }
 0x193   : > { %v2222_v45 = vpack.c.bf16 %v1984_v43, %v718_v44 }
 0x195   : > { %v1987_v46 = vpop.f32.mrb[14].mxu0  ;;  %2223 = vmatprep.subr.bf16.mxu1 %v2222_v45 }
 0x196   : > { %v728_v47 = vpop.f32.mrb[15].mxu0  ;;  %2225 = vmatpush3.bf16.msra.mxu1 %v2222_v45 }
 0x197   : > { %v2226_v48 = vpack.c.bf16 %v1987_v46, %v728_v47 }
 0x199   : > { %2227 = vmatprep.subr.bf16.mxu1 %v2226_v48 }
 0x19a   : > { %2229 = vmatpush3.bf16.msra.mxu1 %v2226_v48 }
 0x19d   : > { %2021 = vmatmul.mubr.f32.vlgmr.msra.gmra.mrb[0].mxu1 %v3004_v49 }
 0x19e   : > { %2023 = vmatprep.mubr.f32.mxu1 %v3007_v50 }
 0x1a1   : > { %2024 = vmatmul.mubr.f32.gmra.mrb[2].mxu1 %v3012_v51 }
 0x1a2   : > { %2026 = vmatprep.mubr.f32.mxu1 %v3015_v52 }
 0x1a5   : > { %2027 = vmatmul.mubr.f32.gmra.mrb[4].mxu1 %v3020_v53 }
 0x1a6   : > { %2029 = vmatprep.mubr.f32.mxu1 %v3023_v54 }
 0x1a9   : > { %2030 = vmatmul.mubr.f32.gmra.mrb[6].mxu1 %v3028_v55 }
 0x1aa   : > { %2032 = vmatprep.mubr.f32.mxu1 %v3031_v56 }
 0x1ad   : > { %2033 = vmatmul.mubr.f32.gmra.mrb[8].mxu1 %v3036_v57 }
 0x1ae   : > { %2035 = vmatprep.mubr.f32.mxu1 %v3039_v58 }
 0x1b1   : > { %2036 = vmatmul.mubr.f32.gmra.mrb[10].mxu1 %v3044_v59 }
 0x1b2   : > { %2038 = vmatprep.mubr.f32.mxu1 %v3047_v60 }
 0x1b5   : > { %2039 = vmatmul.mubr.f32.gmra.mrb[12].mxu1 %v3052_v61 }
 0x1b6   : > { %2041 = vmatprep.mubr.f32.mxu1 %v3055_v62 }
 0x1b9   : > { %2042 = vmatmul.mubr.f32.gmra.mrb[14].mxu1 %v3060_v63 }
 0x1ba   : > { %2108 = vmatprep.mubr.f32.mxu1 %v3000_v18 }
 0x270   : > { %v2022_v5 = vpop.f32.mrb[0].mxu1 }
 0x271   : > { %v813_v6 = vadd.f32 %v2022_v5, %v740_v4  ;;  %v807_v7 = vpop.f32.mrb[1].mxu1 }
 0x272   : > { %v808_v8 = vadd.f32 %v807_v7, %v740_v4 }
 0x273   : > { %v887_v11 = vmax.f32 %v813_v6, 0.0 }
 0x274   : > { %v886_v9 = vmax.f32 %v808_v8, 0.0  ;;  %v2025_v10 = vpop.f32.mrb[2].mxu1 }
 0x275   : > { %v823_v12 = vadd.f32 %v2025_v10, %v740_v4  ;;  %v817_v13 = vpop.f32.mrb[3].mxu1 }
 0x276   : > { %v818_v14 = vadd.f32 %v817_v13, %v740_v4  ;;  %2052 = vmatprep.mubr.msk.f32.mxu0 %vm906_vm2, %v886_v9 }
 0x277   : > { %2053 = vmatmul.mubr.msk.f32.vlgmr.msra.gmra.mrb[16].mxu0 %vm906_vm2, %v887_v11  ;;  %v889_v17 = vmax.f32 %v823_v12, 0.0 }
 0x278   : > { %v888_v15 = vmax.f32 %v818_v14, 0.0  ;;  %v2028_v16 = vpop.f32.mrb[4].mxu1 }
 0x279   : > { %v833_v18 = vadd.f32 %v2028_v16, %v740_v4  ;;  %v827_v19 = vpop.f32.mrb[5].mxu1 }
 0x27a   : > { %v828_v20 = vadd.f32 %v827_v19, %v740_v4  ;;  %2055 = vmatprep.mubr.msk.f32.mxu0 %vm906_vm2, %v888_v15 }
 0x27b   : > { %2056 = vmatmul.mubr.msk.f32.gmra.mrb[18].mxu0 %vm906_vm2, %v889_v17  ;;  %v891_v23 = vmax.f32 %v833_v18, 0.0 }
 0x27c   : > { %v890_v21 = vmax.f32 %v828_v20, 0.0  ;;  %v2031_v22 = vpop.f32.mrb[6].mxu1 }
 0x27d   : > { %v843_v24 = vadd.f32 %v2031_v22, %v740_v4  ;;  %v837_v25 = vpop.f32.mrb[7].mxu1 }
 0x27e   : > { %v838_v26 = vadd.f32 %v837_v25, %v740_v4  ;;  %2058 = vmatprep.mubr.msk.f32.mxu0 %vm906_vm2, %v890_v21 }
 0x27f   : > { %2059 = vmatmul.mubr.msk.f32.gmra.mrb[20].mxu0 %vm906_vm2, %v891_v23  ;;  %v893_v29 = vmax.f32 %v843_v24, 0.0 }
 0x280   : > { %v892_v27 = vmax.f32 %v838_v26, 0.0  ;;  %v2034_v28 = vpop.f32.mrb[8].mxu1 }
 0x281   : > { %v853_v30 = vadd.f32 %v2034_v28, %v740_v4  ;;  %v847_v31 = vpop.f32.mrb[9].mxu1 }
 0x282   : > { %v848_v32 = vadd.f32 %v847_v31, %v740_v4  ;;  %2061 = vmatprep.mubr.msk.f32.mxu0 %vm906_vm2, %v892_v27 }
 0x283   : > { %2062 = vmatmul.mubr.msk.f32.gmra.mrb[22].mxu0 %vm906_vm2, %v893_v29  ;;  %v895_v35 = vmax.f32 %v853_v30, 0.0 }
 0x284   : > { %v894_v33 = vmax.f32 %v848_v32, 0.0  ;;  %v2037_v34 = vpop.f32.mrb[10].mxu1 }
 0x285   : > { %v863_v36 = vadd.f32 %v2037_v34, %v740_v4  ;;  %v857_v37 = vpop.f32.mrb[11].mxu1 }
 0x286   : > { %v858_v38 = vadd.f32 %v857_v37, %v740_v4  ;;  %2064 = vmatprep.mubr.msk.f32.mxu0 %vm906_vm2, %v894_v33 }
 0x287   : > { %2065 = vmatmul.mubr.msk.f32.gmra.mrb[24].mxu0 %vm906_vm2, %v895_v35  ;;  %v897_v41 = vmax.f32 %v863_v36, 0.0 }
 0x288   : > { %v896_v39 = vmax.f32 %v858_v38, 0.0  ;;  %v2040_v40 = vpop.f32.mrb[12].mxu1 }
 0x289   : > { %v873_v42 = vadd.f32 %v2040_v40, %v740_v4  ;;  %v867_v43 = vpop.f32.mrb[13].mxu1 }
 0x28a   : > { %v868_v44 = vadd.f32 %v867_v43, %v740_v4  ;;  %2067 = vmatprep.mubr.msk.f32.mxu0 %vm906_vm2, %v896_v39 }
 0x28b   : > { %2068 = vmatmul.mubr.msk.f32.gmra.mrb[26].mxu0 %vm906_vm2, %v897_v41  ;;  %v899_v47 = vmax.f32 %v873_v42, 0.0 }
 0x28c   : > { %v898_v45 = vmax.f32 %v868_v44, 0.0  ;;  %v2043_v46 = vpop.f32.mrb[14].mxu1 }
 0x28d   : > { %v883_v48 = vadd.f32 %v2043_v46, %v740_v4  ;;  %v877_v0 = vpop.f32.mrb[15].mxu1 }
 0x28e   : > { %v878_v5 = vadd.f32 %v877_v0, %v740_v4  ;;  %2070 = vmatprep.mubr.msk.f32.mxu0 %vm906_vm2, %v898_v45 }
 0x28f   : > { %2071 = vmatmul.mubr.msk.f32.gmra.mrb[28].mxu0 %vm906_vm2, %v899_v47  ;;  %v901_v7 = vmax.f32 %v883_v48, 0.0 }
 0x290   : > { %v900_v6 = vmax.f32 %v878_v5, 0.0 }
 0x292   : > { %2073 = vmatprep.mubr.msk.f32.mxu0 %vm906_vm2, %v900_v6 }
 0x293   : > { %2074 = vmatmul.mubr.msk.f32.gmra.mrb[30].mxu0 %vm906_vm2, %v901_v7 }
 0x34a   : > { %v2054_v8 = vpop.f32.mrb[16].mxu0 }
 0x34b   : > { %v1021_v9 = vpop.f32.mrb[17].mxu0 }
 0x34c   : > { %v2238_v10 = vpack.c.bf16 %v2054_v8, %v1021_v9 }
 0x34e   : > { %v2057_v11 = vpop.f32.mrb[18].mxu0  ;;  %2239 = vmatprep.subr.bf16.mxu1 %v2238_v10 }
 0x34f   : > { %v1031_v12 = vpop.f32.mrb[19].mxu0  ;;  %2241 = vmatpush3.bf16.msra.mxu1 %v2238_v10 }
 0x350   : > { %v2242_v13 = vpack.c.bf16 %v2057_v11, %v1031_v12 }
 0x352   : > { %v2060_v14 = vpop.f32.mrb[20].mxu0  ;;  %2243 = vmatprep.subr.bf16.mxu1 %v2242_v13 }
 0x353   : > { %v1041_v4 = vpop.f32.mrb[21].mxu0  ;;  %2245 = vmatpush3.bf16.msra.mxu1 %v2242_v13 }
 0x354   : > { %v2246_v15 = vpack.c.bf16 %v2060_v14, %v1041_v4 }
 0x356   : > { %v2063_v16 = vpop.f32.mrb[22].mxu0  ;;  %2247 = vmatprep.subr.bf16.mxu1 %v2246_v15 }
 0x357   : > { %v1051_v17 = vpop.f32.mrb[23].mxu0  ;;  %2249 = vmatpush3.bf16.msra.mxu1 %v2246_v15 }
 0x358   : > { %v2250_v18 = vpack.c.bf16 %v2063_v16, %v1051_v17 }
 0x35a   : > { %v2066_v19 = vpop.f32.mrb[24].mxu0  ;;  %2251 = vmatprep.subr.bf16.mxu1 %v2250_v18 }
 0x35b   : > { %v1061_v20 = vpop.f32.mrb[25].mxu0  ;;  %2253 = vmatpush3.bf16.msra.mxu1 %v2250_v18 }
 0x35c   : > { %v2254_v21 = vpack.c.bf16 %v2066_v19, %v1061_v20 }
 0x35e   : > { %v2069_v22 = vpop.f32.mrb[26].mxu0  ;;  %2255 = vmatprep.subr.bf16.mxu1 %v2254_v21 }
 0x35f   : > { %v1071_v23 = vpop.f32.mrb[27].mxu0  ;;  %2257 = vmatpush3.bf16.msra.mxu1 %v2254_v21 }
 0x360   : > { %v2258_v24 = vpack.c.bf16 %v2069_v22, %v1071_v23 }
 0x362   : > { %v2072_v25 = vpop.f32.mrb[28].mxu0  ;;  %2259 = vmatprep.subr.bf16.mxu1 %v2258_v24 }
 0x363   : > { %v1081_v26 = vpop.f32.mrb[29].mxu0  ;;  %2261 = vmatpush3.bf16.msra.mxu1 %v2258_v24 }
 0x364   : > { %v2262_v27 = vpack.c.bf16 %v2072_v25, %v1081_v26 }
 0x366   : > { %v2075_v28 = vpop.f32.mrb[30].mxu0  ;;  %2263 = vmatprep.subr.bf16.mxu1 %v2262_v27 }
 0x367   : > { %v1091_v29 = vpop.f32.mrb[31].mxu0  ;;  %2265 = vmatpush3.bf16.msra.mxu1 %v2262_v27  ;;  %v1342_v27 = vld [vmem:[%s3209_s6] sm:$0xff] }
 0x368   : > { %v2266_v30 = vpack.c.bf16 %v2075_v28, %v1091_v29  ;;  %v1343_v28 = vld [vmem:[%s3209_s6 + $0x8] sm:$0xff] }
 0x36a   : > { %2267 = vmatprep.subr.bf16.mxu1 %v2266_v30 }
 0x36b   : > { %2269 = vmatpush3.bf16.msra.mxu1 %v2266_v30 }
 0x36e   : > { %2109 = vmatmul.mubr.f32.vlgmr.msra.gmra.mrb[16].mxu1 %v3004_v49  ;;  %v1265_v49 = vld [vmem:[#allocation6] sm:$0xff] }
 0x36f   : > { %2111 = vmatprep.mubr.f32.mxu1 %v3007_v50  ;;  %2164 = vmatprep.mubr.f32.mxu0 %v1265_v49  ;;  %v1102_v50 = vsub.s32 1, %v3064_v1  ;;  %v2302_v49 = vpack.c.bf16 %v1343_v28, %v1342_v27 }
 0x372   : > { %2112 = vmatmul.mubr.f32.gmra.mrb[18].mxu1 %v3012_v51  ;;  %v3108_v51 = vrot.slane %v3070_v3, %v1102_v50  ;;  %v1344_v50 = vld [vmem:[%s3209_s6 + $0x10] sm:$0xff] }
 0x373   : > { %2114 = vmatprep.mubr.f32.mxu1 %v3015_v52 }
 0x376   : > { %2115 = vmatmul.mubr.f32.gmra.mrb[20].mxu1 %v3020_v53 }
 0x377   : > { %2117 = vmatprep.mubr.f32.mxu1 %v3023_v54 }
 0x37a   : > { %2118 = vmatmul.mubr.f32.gmra.mrb[22].mxu1 %v3028_v55 }
 0x37b   : > { %2120 = vmatprep.mubr.f32.mxu1 %v3031_v56 }
 0x37e   : > { %2121 = vmatmul.mubr.f32.gmra.mrb[24].mxu1 %v3036_v57 }
 0x37f   : > { %2123 = vmatprep.mubr.f32.mxu1 %v3039_v58 }
 0x382   : > { %2124 = vmatmul.mubr.f32.gmra.mrb[26].mxu1 %v3044_v59 }
 0x383   : > { %2126 = vmatprep.mubr.f32.mxu1 %v3047_v60 }
 0x386   : > { %2127 = vmatmul.mubr.f32.gmra.mrb[28].mxu1 %v3052_v61 }
 0x387   : > { %2129 = vmatprep.mubr.f32.mxu1 %v3055_v62 }
 0x38a   : > { %2130 = vmatmul.mubr.f32.gmra.mrb[30].mxu1 %v3060_v63 }
 0x441   : > { %v2110_v52 = vpop.f32.mrb[16].mxu1 }
 0x442   : > { %v1176_v53 = vadd.f32 %v2110_v52, %v3108_v51  ;;  %v1170_v54 = vpop.f32.mrb[17].mxu1  ;;  %v1266_v52 = vld [vmem:[#allocation6 + $0x8] sm:$0xff] }
 0x443   : > { %v1171_v55 = vadd.f32 %v1170_v54, %v3108_v51  ;;  %v1431_v54 = vld [vmem:[#allocation11] sm:$0xff] }
 0x444   : > { %v1250_v56 = vmax.f32 %v1176_v53, 0.0 }
 0x445   : > { %v1249_v57 = vmax.f32 %v1171_v55, 0.0  ;;  %v2113_v58 = vpop.f32.mrb[18].mxu1  ;;  %v1432_v55 = vld [vmem:[#allocation11 + $0x8] sm:$0xff] }
 0x446   : > { %v1186_v59 = vadd.f32 %v2113_v58, %v3108_v51  ;;  %v1180_v60 = vpop.f32.mrb[19].mxu1 }
 0x447   : > { %v2270_v61 = vpack.c.bf16 %v1250_v56, %v1249_v57  ;;  %v1181_v62 = vadd.f32 %v1180_v60, %v3108_v51  ;;  %v2310_v56 = vpack.c.bf16 %v1432_v55, %v1431_v54  ;;  %v1434_v60 = vld [vmem:[#allocation11 + $0x18] sm:$0xff] }
 0x448   : > { %v1252_v63 = vmax.f32 %v1186_v59, 0.0  ;;  %v1433_v59 = vld [vmem:[#allocation11 + $0x10] sm:$0xff] }
 0x449   : > { %v1251_v31 = vmax.f32 %v1181_v62, 0.0  ;;  %v2116_v32 = vpop.f32.mrb[20].mxu1  ;;  %2271 = vmatprep.subr.bf16.mxu0 %v2270_v61  ;;  %v1435_v62 = vld [vmem:[#allocation11 + $0x20] sm:$0x7] }
 0x44a   : > { %v1196_v33 = vadd.f32 %v2116_v32, %v3108_v51  ;;  %v1190_v34 = vpop.f32.mrb[21].mxu1  ;;  %2273 = vmatpush3.bf16.msra.mxu0 %v2270_v61  ;;  %v2314_v61 = vpack.c.bf16 %v1434_v60, %v1433_v59 }
 0x44b   : > { %v2274_v35 = vpack.c.bf16 %v1252_v63, %v1251_v31  ;;  %v1191_v36 = vadd.f32 %v1190_v34, %v3108_v51  ;;  %v1347_v63 = vld [vmem:[%s2936_s23 + $0x8] sm:$0xff]  ;;  %v1346_v31 = vld [vmem:[%s2936_s23] sm:$0xff] }
 0x44c   : > { %v1254_v37 = vmax.f32 %v1196_v33, 0.0 }
 0x44d   : > { %v1253_v38 = vmax.f32 %v1191_v36, 0.0  ;;  %v2119_v39 = vpop.f32.mrb[22].mxu1  ;;  %2275 = vmatprep.subr.bf16.mxu0 %v2274_v35 }
 0x44e   : > { %v1206_v40 = vadd.f32 %v2119_v39, %v3108_v51  ;;  %v1200_v41 = vpop.f32.mrb[23].mxu1  ;;  %2277 = vmatpush3.bf16.msra.mxu0 %v2274_v35  ;;  %v2643_v39 = vmov 0.0  }
 0x44f   : > { %v2278_v42 = vpack.c.bf16 %v1254_v37, %v1253_v38  ;;  %v1201_v43 = vadd.f32 %v1200_v41, %v3108_v51  ;;  %v2641_v38 = vmov 0.0|0.0   ;;  %v2644_v41 = vmov 0  }
 0x450   : > { %v1256_v44 = vmax.f32 %v1206_v40, 0.0  ;;  %v1529_v40 = vld [vmem:[#allocation2] sm:$0x1]  ;;  %2415 = vset.pattern.permute.xlu0 %v2644_v41 }
 0x451   : > { %v1255_v45 = vmax.f32 %v1201_v43, 0.0  ;;  %v2122_v46 = vpop.f32.mrb[24].mxu1  ;;  %2279 = vmatprep.subr.bf16.mxu0 %v2278_v42  ;;  %1532 = vperm.xlu0 %2415, %v1529_v40  }
 0x452   : > { %v1216_v47 = vadd.f32 %v2122_v46, %v3108_v51  ;;  %v1210_v48 = vpop.f32.mrb[25].mxu1  ;;  %2281 = vmatpush3.bf16.msra.mxu0 %v2278_v42  ;;  %v1438_v42 = vsub.s32 2, %v3064_v1 }
 0x453   : > { %v2282_v0 = vpack.c.bf16 %v1256_v44, %v1255_v45  ;;  %v1211_v5 = vadd.f32 %v1210_v48, %v3108_v51 }
 0x454   : > { %v1258_v6 = vmax.f32 %v1216_v47, 0.0  ;;  %v1439_v43 = vrot.slane %v3070_v3, %v1438_v42 }
 0x455   : > { %v1257_v7 = vmax.f32 %v1211_v5, 0.0  ;;  %v2125_v8 = vpop.f32.mrb[26].mxu1  ;;  %2283 = vmatprep.subr.bf16.mxu0 %v2282_v0 }
 0x456   : > { %v1226_v9 = vadd.f32 %v2125_v8, %v3108_v51  ;;  %v1220_v10 = vpop.f32.mrb[27].mxu1  ;;  %2285 = vmatpush3.bf16.msra.mxu0 %v2282_v0 }
 0x457   : > { %v2286_v11 = vpack.c.bf16 %v1258_v6, %v1257_v7  ;;  %v1221_v12 = vadd.f32 %v1220_v10, %v3108_v51  ;;  %v1528_v6 = vld [vmem:[%s3239_s30] sm:$0x1] }
 0x458   : > { %v1260_v13 = vmax.f32 %v1226_v9, 0.0 }
 0x459   : > { %v1259_v14 = vmax.f32 %v1221_v12, 0.0  ;;  %v2128_v4 = vpop.f32.mrb[28].mxu1  ;;  %2287 = vmatprep.subr.bf16.mxu0 %v2286_v11 }
 0x45a   : > { %v1236_v15 = vadd.f32 %v2128_v4, %v3108_v51  ;;  %v1230_v16 = vpop.f32.mrb[29].mxu1  ;;  %2289 = vmatpush3.bf16.msra.mxu0 %v2286_v11 }
 0x45b   : > { %v2290_v17 = vpack.c.bf16 %v1260_v13, %v1259_v14  ;;  %v1231_v18 = vadd.f32 %v1230_v16, %v3108_v51 }
 0x45c   : > { %v1262_v19 = vmax.f32 %v1236_v15, 0.0 }
 0x45d   : > { %v1261_v20 = vmax.f32 %v1231_v18, 0.0  ;;  %v2131_v21 = vpop.f32.mrb[30].mxu1  ;;  %2291 = vmatprep.subr.bf16.mxu0 %v2290_v17 }
 0x45e   : > { %v1246_v22 = vadd.f32 %v2131_v21, %v3108_v51  ;;  %v1240_v23 = vpop.f32.mrb[31].mxu1  ;;  %2293 = vmatpush3.bf16.msra.mxu0 %v2290_v17 }
 0x45f   : > { %v2294_v24 = vpack.c.bf16 %v1262_v19, %v1261_v20  ;;  %v1241_v25 = vadd.f32 %v1240_v23, %v3108_v51  ;;  %v1345_v51 = vld [vmem:[%s3209_s6 + $0x18] sm:$0xff] }
 0x460   : > { %v1264_v26 = vmax.f32 %v1246_v22, 0.0  ;;  %v2306_v53 = vpack.c.bf16 %v1345_v51, %v1344_v50 }
 0x461   : > { %v1263_v29 = vmax.f32 %v1241_v25, 0.0  ;;  %2295 = vmatprep.subr.bf16.mxu0 %v2294_v24 }
 0x462   : > { %2297 = vmatpush3.bf16.msra.mxu0 %v2294_v24 }
 0x463   : > { %v2298_v30 = vpack.c.bf16 %v1264_v26, %v1263_v29 }
 0x465   : > { %2299 = vmatprep.subr.bf16.mxu0 %v2298_v30 }
 0x466   : > { %2301 = vmatpush3.bf16.msra.mxu0 %v2298_v30 }
 0x467   : > { %2303 = vmatprep.subr.bf16.mxu0 %v2302_v49 }
 0x469   : > { %2165 = vmatmul.mubr.f32.vlgmr.msra.gmra.mrb[32].mxu0 %v1266_v52 }
 0x46a   : > { %2305 = vmatpush3.bf16.msra.mxu0 %v2302_v49 }
 0x46b   : > { %2307 = vmatprep.subr.bf16.mxu0 %v2306_v53 }
 0x46e   : > { %2309 = vmatpush3.bf16.msra.mxu0 %v2306_v53 }
 0x46f   : > { %2311 = vmatprep.subr.bf16.mxu0 %v2310_v56 }
 0x4d0   : > { %v1533_v3 = vpop.permute.xlu0 %1532 }
 0x4d1   : > { %v1538_v7 = vrot.slane %v1533_v3, %v739_v2 }
 0x53c   : > { %v2166_v57 = vpop.f32.mrb[32].mxu0 }
 0x53d   : > { %v1333_v58 = vpop.f32.mrb[33].mxu0 }
 0x53e   : > { %2175 = vmatprep.mubr.msk.f32.mxu0 %vm906_vm2, %v1333_v58 }
 0x53f   : > { %2176 = vmatmul.mubr.msk.f32.vlgmr.msra.gmra.mrb[34].mxu0 %vm906_vm2, %v2166_v57 }
 0x540   : > { %2313 = vmatpush3.bf16.msra.mxu0 %v2310_v56 }
 0x541   : > { %2315 = vmatprep.subr.bf16.mxu0 %v2314_v61 }
 0x544   : > { %2317 = vmatpush3.bf16.msra.mxu0 %v2314_v61 }
 0x545   : > { %2186 = vmatprep.subr.msk.mxu0 %vm1447_vm3, %v1435_v62 }
 0x548   : > { %2187 = vmatpush3.msk.msra.mxu0 %vm1447_vm3, %v1435_v62 }
 0x549   : > { %2318 = vmatprep.subr.bf16.mxu0 %v2641_v38 }
 0x612   : > { %v2177_v32 = vpop.f32.mrb[34].mxu0 }
 0x613   : > { %v1426_v33 = vadd.f32 %v2177_v32, %v1347_v63  ;;  %v1420_v34 = vpop.f32.mrb[35].mxu0 }
 0x614   : > { %v1421_v35 = vadd.f32 %v1420_v34, %v1346_v31 }
 0x615   : > { %v1430_v37 = vmax.f32 %v1426_v33, 0.0 }
 0x616   : > { %v1429_v36 = vmax.f32 %v1421_v35, 0.0 }
 0x618   : > { %2188 = vmatprep.mubr.msk.f32.mxu0 %vm1440_vm4, %v1429_v36 }
 0x619   : > { %2189 = vmatmul.mubr.msk.f32.vlgmr.msra.gmra.mrb[36].mxu0 %vm1440_vm4, %v1430_v37 }
 0x61a   : > { %2195 = vmatprep.mubr.msk.f32.mxu0 %vm2642_vm5, %v2643_v39 }
 0x6ec   : > { %v2190_v44 = vpop.f32.mrb[36].mxu0 }
 0x6ed   : > { %v1523_v45 = vadd.f32 %v2190_v44, %v1439_v43  ;;  %v1517_v46 = vpop.f32.mrb[37].mxu0 }
 0x6ee   : > { %v1518_v47 = vadd.f32 %v1517_v46, %v1439_v43 }
 0x6ef   : > { %v1527_v48 = vmax.f32 %v1523_v45, 0.0 }
 0x6f0   : > { %v1526_v0 = vmax.f32 %v1518_v47, 0.0 }
 0x6f2   : > { %v2319_v5 = vpack.c.bf16 %v1527_v48, %v1526_v0 }
 0x6f4   : > { %2321 = vmatpush3.bf16.xpose.msk.msra.mxu0 %vm2320_vm6, %v2319_v5 }
 0x6fb   : > { %2196 = vmatmul.mubr.msk.f32.vlgmr.msra.gmra.mrb[38].mxu0 %vm1440_vm4, %v1528_v6 }
 0x7ce   : > { %v1614_v8 = vpop.f32.mrb[38].mxu0 }
 0x7cf   : > { %v1615_v9 = vadd.f32 %v1614_v8, %v1538_v7  ;;  %v2197_v10 = vpop.f32.mrb[39].mxu0 }
 0x7d1   : > { %1619 = vst.msk [vmem:[%s492_s19] sm:$0x1] %vm1618_vm7, %v1615_v9 }
 0x7d2   : > { %2571 = shalt.err (!%p2568_p0)
}
 0x7d3   : > { %s2572_s11 = scalar_lea.hbm %s3159_s24, 16  ;;  %s2576_s29 = scalar_lea.hbm %s3240_s14, 32 }
 0x7d4   : > { %p2573_p11 = scmp.ne.s32.totalorder %s3159_s24, %s2572_s11  ;;  %p2577_p8 = scmp.lt.u32.totalorder %s3159_s24, %s3240_s14 }
 0x7d5   : > { %p2578_p3 = scmp.lt.u32.totalorder %s2576_s29, %s2572_s11  ;;  %p2580_p7 = scmp.lt.u32.totalorder %s2572_s11, %s3159_s24 }
 0x7d6   : > { %p2574_p6 = pnand %p2573_p11, %p2877_p10 }
 0x7d7   : > { %p2579_p5 = por %p2578_p3, %p2577_p8 }
 0x7d8   : > { %p2575_p4 = pneg %p2574_p6 }
 0x7d9   : > { %p2581_p12 = por %p2580_p7, %p2579_p5 }
 0x7db   : > { %p2582_p1 = pnand %p2581_p12, %p2575_p4 }
 0x7dd   : > { %2585 = shalt.err (!%p2582_p1)
}
 0x7de   : > { %2340 = dma.vmem_to_hbm [thread:$0]  (%p2877_p10), %s3161_s10, 16, %s3159_s24, %s1621_s16  }
 0x7df PF: > { %s3241_s15 = sld [smem:[#allocation17_spill]]  ;;  %s3242_s13 = sld [smem:[#allocation18_spill]] }
 0x7e0   : > { %p3244_p13 = scmp.ge.s32.totalorder %s2632_s22, 2 }
 0x7e5   : > { %s1645_s17 = sand.u32 1, %s3241_s15   ;;  %p3243_p2 = scmp.ne.s32.totalorder %s3242_s13, 0 }
 0x7e6   : > { %s1646_s28 = scalar_lea.sflag [#allocation5], %s1645_s17 }
 0x7e7   : > { %p2360_p9 = pnand %p3244_p13, %p3243_p2 }
 0x7e9   : > { %2615 = dma.done.wait (!%p2360_p9), %s1646_s28, 16  }
 0x7ea   : > { %2617 = vsyncadd (!%p2360_p9), %s1646_s28, 4294967280  ;;  %p28_p0 = scmp.ge.s32.totalorder %s2867_s27, 4   ;;  %s3245_s19 = smov %s2624_s20 }
 0x7eb   : > { %s3246_s20 = smov %s2628_s21  ;;  %s3247_s21 = smov %s2883_s18 }
 0x7ec   : > { %s3248_s22 = smov %s2867_s27  ;;  %30 = sbr.rel (!%p28_p0) target bundleno = 10 (0xa), region = 131 }
 0x7f3   :  { %1650 = vsyncpa [#allocation4], 1 }
 0x7f4   :  { %1652 = vsyncpa [#allocation4 + $0x1], 1 }
 0x7f5   :  { %1653 = vsyncpa [#allocation7], 1 }
 0x7f6   :  { %1654 = vsyncpa [#allocation10], 1 }
 0x7f7   :  { %1655 = vsyncpa [#allocation5], 1 }
 0x7f8   :  { %1657 = vsyncpa [#allocation5 + $0x1], 1 }

</bundles_post_ra>
